<compile_context>
chip_gen: v7x
topology: tpu7x:2x2x1
jax: 0.10.0
libtpu: 0.0.40
codegen_flags: <defaults>
</compile_context>

<pallas_src>
import jax
import jax.numpy as jnp
from jax import lax
from jax.experimental import pallas as pl
from jax.experimental.pallas import tpu as pltpu


def _prelu(x, a):
    # PReLU with a single scalar parameter (PyTorch nn.PReLU() default).
    return jnp.maximum(x, 0.0) + a * jnp.minimum(x, 0.0)


# ---------------------------------------------------------------------------
# Pass 1: fused 1x1-conv embeddings, computed ONCE per pixel, stored as bf16.
# ---------------------------------------------------------------------------
def _embed_kernel(x_ref, w1_ref, b1_ref, w2_ref, b2_ref, wa_ref, ba_ref, a_ref,
                  e1_ref, e2_ref, asm_ref):
    """Grid = (batch, hw-tile).

    x_ref  : (1, C, th) f32    input features
    w*_ref : bf16 1x1-conv weights (Cout, C);  b*_ref: f32 biases (Cout, 1)
    a_ref  : (3,) f32 PReLU scalars [a1, a2, aa]                        (SMEM)
    e1_ref : (1, Cr,  th) bf16 query embedding   (conv_match1)
    e2_ref : (1, Cr,  th) bf16 key embedding     (conv_match2)
    asm_ref: (1, C+1, th) bf16 assembly features (conv_assembly) + ones row
    """
    x = x_ref[0].astype(jnp.bfloat16)                                  # (C, th)

    e1 = jnp.dot(w1_ref[...], x, preferred_element_type=jnp.float32) + b1_ref[...]
    e2 = jnp.dot(w2_ref[...], x, preferred_element_type=jnp.float32) + b2_ref[...]
    asm = jnp.dot(wa_ref[...], x, preferred_element_type=jnp.float32) + ba_ref[...]

    e1_ref[0] = _prelu(e1, a_ref[0]).astype(jnp.bfloat16)
    e2_ref[0] = _prelu(e2, a_ref[1]).astype(jnp.bfloat16)

    asm = _prelu(asm, a_ref[2])                                        # (C, th)
    ones = jnp.ones((1, asm.shape[1]), jnp.float32)                    # denom row
    asm_ref[0] = jnp.concatenate([asm, ones], axis=0).astype(jnp.bfloat16)


# ---------------------------------------------------------------------------
# Pass 2: flash-tiled non-local attention on precomputed embeddings.
# ---------------------------------------------------------------------------
def _attn_kernel(e1_ref, e2_ref, asm_ref, out_ref, m_sc, acc_sc):
    """Grid = (batch, query-tile, kv-tile); kv-tile is the reduction axis.

    e1_ref : (1, Cr,  tq) bf16  query embedding (kv-invariant block -> resident)
    e2_ref : (1, Cr,  tk) bf16  key embedding
    asm_ref: (1, C+1, tk) bf16  assembly features, last row == 1 (denominator)
    out_ref: (1, C,   tq) f32   output tile (lanes = query pixels)
    m_sc   : (1, tq)      f32   flash-softmax running max
    acc_sc : (C+1, tq)    f32   running numerator (+ denominator in last row)
    """
    ki = pl.program_id(2)

    @pl.when(ki == 0)
    def _():
        m_sc[...] = jnp.full_like(m_sc, -jnp.inf)
        acc_sc[...] = jnp.zeros_like(acc_sc)

    e1 = e1_ref[0]                                                     # (Cr, tq)
    e2 = e2_ref[0]                                                     # (Cr, tk)
    asm = asm_ref[0]                                                   # (C+1, tk)

    # Scores, transposed: s[j, i] = sum_c e2[c, j] * e1[c, i]   -> (tk, tq)
    s = lax.dot_general(e2, e1, dimension_numbers=(((0,), (0,)), ((), ())),
                        preferred_element_type=jnp.float32)

    # Online (flash) softmax over the KV / sublane axis.
    m_prev = m_sc[...]                                                 # (1, tq)
    m_new = jnp.maximum(m_prev, jnp.max(s, axis=0, keepdims=True))     # (1, tq)
    alpha = jnp.exp(m_prev - m_new)                                    # (1, tq)
    p = jnp.exp(s - m_new).astype(jnp.bfloat16)                        # (tk, tq)
    # One MXU pass updates numerator rows [0:C] and the denominator row [C]
    # (the appended ones row of asm), both with f32 accumulation.
    acc_sc[...] = alpha * acc_sc[...] + jnp.dot(
        asm, p, preferred_element_type=jnp.float32)                    # (C+1, tq)
    m_sc[...] = m_new

    @pl.when(ki == pl.num_programs(2) - 1)
    def _():
        c = out_ref.shape[1]
        acc = acc_sc[...]
        # Exact divide (runs once per query tile; cheap, keeps numerics tight).
        out_ref[0] = (acc[:c] / acc[c:c + 1]).astype(out_ref.dtype)


# ---------------------------------------------------------------------------
# Wrapper helpers (generation-aware tiling / VMEM budgets).
# ---------------------------------------------------------------------------
def _vmem_capacity_bytes():
    """Physical per-core VMEM; used to make tiles and scoped limits chip-aware."""
    try:
        cap = int(pltpu.get_tpu_info().vmem_capacity_bytes)
        if cap > 0:
            return cap
    except Exception:
        pass
    try:
        kind = jax.devices()[0].device_kind.lower()
        if any(tag in kind for tag in ("v4", "v5", "v6")):
            return 128 * 1024 * 1024
    except Exception:
        pass
    return 64 * 1024 * 1024          # conservative: v7x has 64 MiB per TensorCore


def _pick_tile(hw, max_tile):
    """Largest tile <= max_tile that divides hw and is a multiple of 128."""
    if hw % 128 != 0:
        return hw                    # block must then equal the full extent
    t = max(128, (min(hw, max_tile) // 128) * 128)
    while hw % t != 0:
        t -= 128
    return t


def _scoped_limit(est_bytes, cap_bytes):
    """Generous scoped-VMEM budget, capped below the chip's physical VMEM."""
    return int(min(max(4 * est_bytes, 32 * 1024 * 1024), (3 * cap_bytes) // 4))


def nonlocal_attention(x_nchw, params, *, tq=None, tk=None, th=None):
    """Forward pass equivalent to NonLocalAttention.forward.

    x_nchw: (N, C, H, W) float32  ->  (N, C, H, W) float32
    """
    N, C, H, W = x_nchw.shape
    HW = H * W
    Cr = params["w1"].shape[0]
    Ce = C + 1                                   # assembly rows + ones (denominator)

    x = x_nchw.reshape(N, C, HW)                 # NCHW flatten only; no transpose

    cap = _vmem_capacity_bytes()
    big_vmem = cap >= 100 * 1024 * 1024          # v4/v5e/v6e class (128 MiB)

    auto_tq = tq is None
    tq = tq if tq is not None else _pick_tile(HW, 2048 if big_vmem else 1024)
    tk = tk if tk is not None else _pick_tile(HW, 1024 if big_vmem else 512)
    th = th if th is not None else _pick_tile(HW, 2048)

    # Keep both v7x TensorCores busy: prefer at least 2 units of parallel work.
    if auto_tq and N * (HW // tq) < 2 and tq > 128:
        tq = _pick_tile(HW, max(128, tq // 2))

    assert HW % tq == 0 and HW % tk == 0 and HW % th == 0, (HW, tq, tk, th)
    nq, nk, nh = HW // tq, HW // tk, HW // th

    # Weights pre-cast to bf16 once (tiny); biases / PReLU scalars stay f32.
    w1 = params["w1"].astype(jnp.bfloat16)
    w2 = params["w2"].astype(jnp.bfloat16)
    wa = params["wa"].astype(jnp.bfloat16)
    b1, b2, ba = params["b1"], params["b2"], params["ba"]
    a_vec = jnp.stack([params["a1"], params["a2"], params["aa"]]).astype(jnp.float32)

    # ---------------- pass 1: embeddings, computed once per pixel ------------
    est_emb = (2 * 4 * C * th + 2 * 2 * (2 * Cr + Ce) * th
               + 4 * (C + 2 * Cr) * th + 2 * (2 * Cr * C + C * C))
    e1_all, e2_all, asm_all = pl.pallas_call(
        _embed_kernel,
        out_shape=[jax.ShapeDtypeStruct((N, Cr, HW), jnp.bfloat16),
                   jax.ShapeDtypeStruct((N, Cr, HW), jnp.bfloat16),
                   jax.ShapeDtypeStruct((N, Ce, HW), jnp.bfloat16)],
        grid=(N, nh),
        in_specs=[
            pl.BlockSpec((1, C, th), lambda b, hi: (b, 0, hi)),        # x
            pl.BlockSpec((Cr, C), lambda b, hi: (0, 0)),               # w1
            pl.BlockSpec((Cr, 1), lambda b, hi: (0, 0)),               # b1
            pl.BlockSpec((Cr, C), lambda b, hi: (0, 0)),               # w2
            pl.BlockSpec((Cr, 1), lambda b, hi: (0, 0)),               # b2
            pl.BlockSpec((C, C), lambda b, hi: (0, 0)),                # wa
            pl.BlockSpec((C, 1), lambda b, hi: (0, 0)),                # ba
            pl.BlockSpec(memory_space=pltpu.MemorySpace.SMEM),         # PReLU scalars
        ],
        out_specs=[
            pl.BlockSpec((1, Cr, th), lambda b, hi: (b, 0, hi)),       # e1
            pl.BlockSpec((1, Cr, th), lambda b, hi: (b, 0, hi)),       # e2
            pl.BlockSpec((1, Ce, th), lambda b, hi: (b, 0, hi)),       # asm + ones
        ],
        compiler_params=pltpu.CompilerParams(
            dimension_semantics=("parallel", "parallel"),
            vmem_limit_bytes=_scoped_limit(est_emb, cap)),
    )(x, w1, b1, w2, b2, wa, ba, a_vec)

    # ---------------- pass 2: flash-tiled non-local attention ----------------
    est_attn = (2 * 2 * (Cr * tq + Cr * tk + Ce * tk) + 2 * 4 * C * tq
                + 4 * (Ce + 1) * tq + (4 + 2) * tk * tq)
    out = pl.pallas_call(
        _attn_kernel,
        out_shape=jax.ShapeDtypeStruct((N, C, HW), jnp.float32),
        grid=(N, nq, nk),
        in_specs=[
            pl.BlockSpec((1, Cr, tq), lambda b, qi, ki: (b, 0, qi)),   # e1 (resident)
            pl.BlockSpec((1, Cr, tk), lambda b, qi, ki: (b, 0, ki)),   # e2
            pl.BlockSpec((1, Ce, tk), lambda b, qi, ki: (b, 0, ki)),   # asm + ones
        ],
        out_specs=pl.BlockSpec((1, C, tq), lambda b, qi, ki: (b, 0, qi)),
        scratch_shapes=[
            pltpu.VMEM((1, tq), jnp.float32),      # running max
            pltpu.VMEM((Ce, tq), jnp.float32),     # running numerator + denominator
        ],
        compiler_params=pltpu.CompilerParams(
            dimension_semantics=("parallel", "parallel", "arbitrary"),
            vmem_limit_bytes=_scoped_limit(est_attn, cap)),
    )(e1_all, e2_all, asm_all)

    return out.reshape(N, C, H, W)


def init_params(key, channel, reduction):
    """Deterministic parameter init matching the module's __init__ shapes.

    Conv weights are stored in PyTorch (C_out, C_in) form (1x1 kernels
    squeezed); biases as (C_out, 1) so they broadcast over the lane (HW) axis.
    PReLU params init to 0.25 (PyTorch default).
    """
    cr = channel // reduction
    k1, k2, k3, k4, k5, k6 = jax.random.split(key, 6)
    scale = 1.0 / jnp.sqrt(channel)
    return {
        "w1": jax.random.normal(k1, (cr, channel), jnp.float32) * scale,
        "b1": jax.random.normal(k2, (cr, 1), jnp.float32) * scale,
        "a1": jnp.float32(0.25),
        "w2": jax.random.normal(k3, (cr, channel), jnp.float32) * scale,
        "b2": jax.random.normal(k4, (cr, 1), jnp.float32) * scale,
        "a2": jnp.float32(0.25),
        "wa": jax.random.normal(k5, (channel, channel), jnp.float32) * scale,
        "ba": jax.random.normal(k6, (channel, 1), jnp.float32) * scale,
        "aa": jnp.float32(0.25),
    }


def _reference(x_nchw, params):
    """Pure-JAX f32 reference mirroring the PyTorch module exactly."""
    N, C, H, W = x_nchw.shape
    x = x_nchw.reshape(N, C, H * W)

    def conv(x, w, b, a):
        y = jnp.einsum("oc,nch->noh", w, x) + b[None]
        return jnp.maximum(y, 0.0) + a * jnp.minimum(y, 0.0)

    e1 = conv(x, params["w1"], params["b1"], params["a1"])       # (N, Cr, HW)
    e2 = conv(x, params["w2"], params["b2"], params["a2"])       # (N, Cr, HW)
    asm = conv(x, params["wa"], params["ba"], params["aa"])      # (N, C,  HW)
    score = jnp.einsum("nci,ncj->nij", e1, e2)                   # (N, HW, HW)
    attn = jax.nn.softmax(score, axis=-1)
    out = jnp.einsum("nij,ncj->nci", attn, asm)                  # (N, C, HW)
    return out.reshape(N, C, H, W)


if __name__ == "__main__":
    # Small shapes consistent with the module (channel divisible by reduction=2).
    N, C, H, W = 2, 8, 16, 16
    key = jax.random.PRNGKey(0)
    kx, kp = jax.random.split(key)
    x = jax.random.normal(kx, (N, C, H, W), jnp.float32)
    params = init_params(kp, channel=C, reduction=2)

    ref = _reference(x, params)

    # tq=tk=128 exercises the multi-step flash accumulator (HW=256 -> 2x2 tiles).
    out = nonlocal_attention(x, params, tq=128, tk=128)
    jax.block_until_ready(out)
    assert out.shape == (N, C, H, W), out.shape
    err = float(jnp.max(jnp.abs(out - ref)))
    assert err < 5e-2, f"max abs error vs reference (tiled): {err}"

    # Auto-tiling path (single kv step at this size) must also match.
    out2 = nonlocal_attention(x, params)
    jax.block_until_ready(out2)
    err2 = float(jnp.max(jnp.abs(out2 - ref)))
    assert err2 < 5e-2, f"max abs error vs reference (auto tiles): {err2}"

    print("KERNEL_OK")
</pallas_src>

<mosaic_0001>
module attributes {stable_mosaic.version = 11 : i64} {
  func.func @_embed_kernel(%arg0: i32, %arg1: i32, %arg2: memref<1x8x256xf32, #tpu.memory_space<vmem>>, %arg3: memref<4x8xbf16, #tpu.memory_space<vmem>>, %arg4: memref<4x1xf32, #tpu.memory_space<vmem>>, %arg5: memref<4x8xbf16, #tpu.memory_space<vmem>>, %arg6: memref<4x1xf32, #tpu.memory_space<vmem>>, %arg7: memref<8x8xbf16, #tpu.memory_space<vmem>>, %arg8: memref<8x1xf32, #tpu.memory_space<vmem>>, %arg9: memref<3xf32, #tpu.memory_space<smem>>, %arg10: memref<1x4x256xbf16, #tpu.memory_space<vmem>>, %arg11: memref<1x4x256xbf16, #tpu.memory_space<vmem>>, %arg12: memref<1x9x256xbf16, #tpu.memory_space<vmem>>) attributes {dimension_semantics = [#tpu.dimension_semantics<parallel>, #tpu.dimension_semantics<parallel>], iteration_bounds = array<i64: 2, 1>, scalar_prefetch = 0 : i64, scratch_operands = 0 : i64, tpu.core_type = #tpu.core_type<tc>, window_params = [{transform_indices = @transform_0, window_bounds = array<i64: 1, 8, 256>}, {pipeline_mode = #tpu.pipeline_mode<synchronous>, transform_indices = @transform_1, window_bounds = array<i64: 4, 8>}, {pipeline_mode = #tpu.pipeline_mode<synchronous>, transform_indices = @transform_2, window_bounds = array<i64: 4, 1>}, {pipeline_mode = #tpu.pipeline_mode<synchronous>, transform_indices = @transform_3, window_bounds = array<i64: 4, 8>}, {pipeline_mode = #tpu.pipeline_mode<synchronous>, transform_indices = @transform_4, window_bounds = array<i64: 4, 1>}, {pipeline_mode = #tpu.pipeline_mode<synchronous>, transform_indices = @transform_5, window_bounds = array<i64: 8, 8>}, {pipeline_mode = #tpu.pipeline_mode<synchronous>, transform_indices = @transform_6, window_bounds = array<i64: 8, 1>}, {transform_indices = @transform_7, window_bounds = array<i64: 3>}, {transform_indices = @transform_8, window_bounds = array<i64: 1, 4, 256>}, {transform_indices = @transform_9, window_bounds = array<i64: 1, 4, 256>}, {transform_indices = @transform_10, window_bounds = array<i64: 1, 9, 256>}]} {
    %c0 = arith.constant 0 : index
    %c0_0 = arith.constant 0 : index
    %c0_1 = arith.constant 0 : index
    %0 = vector.load %arg2[%c0, %c0_0, %c0_1] : memref<1x8x256xf32, #tpu.memory_space<vmem>>, vector<1x8x256xf32>
    %1 = vector.shape_cast %0 : vector<1x8x256xf32> to vector<8x256xf32>
    %2 = arith.truncf %1 : vector<8x256xf32> to vector<8x256xbf16>
    %c0_2 = arith.constant 0 : index
    %c0_3 = arith.constant 0 : index
    %3 = vector.load %arg3[%c0_2, %c0_3] : memref<4x8xbf16, #tpu.memory_space<vmem>>, vector<4x8xbf16>
    %cst = arith.constant dense<0.000000e+00> : vector<4x256xf32>
    %4 = tpu.matmul %3, %2, %cst {dimension_numbers = #tpu.dot_dimension_numbers<[1], [0], [0], [1], [0, 0, 1, 1], [], []>} : vector<4x8xbf16>, vector<8x256xbf16>, vector<4x256xf32> -> vector<4x256xf32>
    %c0_4 = arith.constant 0 : index
    %c0_5 = arith.constant 0 : index
    %5 = vector.load %arg4[%c0_4, %c0_5] : memref<4x1xf32, #tpu.memory_space<vmem>>, vector<4x1xf32>
    %6 = vector.broadcast %5 : vector<4x1xf32> to vector<4x256xf32>
    %7 = arith.addf %4, %6 : vector<4x256xf32>
    %c0_6 = arith.constant 0 : index
    %c0_7 = arith.constant 0 : index
    %8 = vector.load %arg5[%c0_6, %c0_7] : memref<4x8xbf16, #tpu.memory_space<vmem>>, vector<4x8xbf16>
    %cst_8 = arith.constant dense<0.000000e+00> : vector<4x256xf32>
    %9 = tpu.matmul %8, %2, %cst_8 {dimension_numbers = #tpu.dot_dimension_numbers<[1], [0], [0], [1], [0, 0, 1, 1], [], []>} : vector<4x8xbf16>, vector<8x256xbf16>, vector<4x256xf32> -> vector<4x256xf32>
    %c0_9 = arith.constant 0 : index
    %c0_10 = arith.constant 0 : index
    %10 = vector.load %arg6[%c0_9, %c0_10] : memref<4x1xf32, #tpu.memory_space<vmem>>, vector<4x1xf32>
    %11 = vector.broadcast %10 : vector<4x1xf32> to vector<4x256xf32>
    %12 = arith.addf %9, %11 : vector<4x256xf32>
    %c0_11 = arith.constant 0 : index
    %c0_12 = arith.constant 0 : index
    %13 = vector.load %arg7[%c0_11, %c0_12] : memref<8x8xbf16, #tpu.memory_space<vmem>>, vector<8x8xbf16>
    %cst_13 = arith.constant dense<0.000000e+00> : vector<8x256xf32>
    %14 = tpu.matmul %13, %2, %cst_13 {dimension_numbers = #tpu.dot_dimension_numbers<[1], [0], [0], [1], [0, 0, 1, 1], [], []>} : vector<8x8xbf16>, vector<8x256xbf16>, vector<8x256xf32> -> vector<8x256xf32>
    %c0_14 = arith.constant 0 : index
    %c0_15 = arith.constant 0 : index
    %15 = vector.load %arg8[%c0_14, %c0_15] : memref<8x1xf32, #tpu.memory_space<vmem>>, vector<8x1xf32>
    %16 = vector.broadcast %15 : vector<8x1xf32> to vector<8x256xf32>
    %17 = arith.addf %14, %16 : vector<8x256xf32>
    %c0_16 = arith.constant 0 : index
    %18 = memref.load %arg9[%c0_16] : memref<3xf32, #tpu.memory_space<smem>>
    %cst_17 = arith.constant 0.000000e+00 : f32
    %19 = vector.broadcast %cst_17 : f32 to vector<4x256xf32>
    %20 = arith.maximumf %7, %19 : vector<4x256xf32>
    %cst_18 = arith.constant 0.000000e+00 : f32
    %21 = vector.broadcast %cst_18 : f32 to vector<4x256xf32>
    %22 = arith.minimumf %7, %21 : vector<4x256xf32>
    %23 = vector.broadcast %18 : f32 to vector<4x256xf32>
    %24 = arith.mulf %23, %22 : vector<4x256xf32>
    %25 = arith.addf %20, %24 : vector<4x256xf32>
    %26 = arith.truncf %25 : vector<4x256xf32> to vector<4x256xbf16>
    %c0_19 = arith.constant 0 : index
    %c0_20 = arith.constant 0 : index
    %c0_21 = arith.constant 0 : index
    %27 = vector.load %arg10[%c0_19, %c0_20, %c0_21] : memref<1x4x256xbf16, #tpu.memory_space<vmem>>, vector<1x4x256xbf16>
    %28 = vector.shape_cast %27 : vector<1x4x256xbf16> to vector<4x256xbf16>
    %29 = vector.shape_cast %26 : vector<4x256xbf16> to vector<1x4x256xbf16>
    tpu.vector_store %arg10[%c0_19, %c0_20, %c0_21], %29 {strides = array<i32>} : memref<1x4x256xbf16, #tpu.memory_space<vmem>>, vector<1x4x256xbf16>,
    %c1 = arith.constant 1 : index
    %30 = memref.load %arg9[%c1] : memref<3xf32, #tpu.memory_space<smem>>
    %cst_22 = arith.constant 0.000000e+00 : f32
    %31 = vector.broadcast %cst_22 : f32 to vector<4x256xf32>
    %32 = arith.maximumf %12, %31 : vector<4x256xf32>
    %cst_23 = arith.constant 0.000000e+00 : f32
    %33 = vector.broadcast %cst_23 : f32 to vector<4x256xf32>
    %34 = arith.minimumf %12, %33 : vector<4x256xf32>
    %35 = vector.broadcast %30 : f32 to vector<4x256xf32>
    %36 = arith.mulf %35, %34 : vector<4x256xf32>
    %37 = arith.addf %32, %36 : vector<4x256xf32>
    %38 = arith.truncf %37 : vector<4x256xf32> to vector<4x256xbf16>
    %c0_24 = arith.constant 0 : index
    %c0_25 = arith.constant 0 : index
    %c0_26 = arith.constant 0 : index
    %39 = vector.load %arg11[%c0_24, %c0_25, %c0_26] : memref<1x4x256xbf16, #tpu.memory_space<vmem>>, vector<1x4x256xbf16>
    %40 = vector.shape_cast %39 : vector<1x4x256xbf16> to vector<4x256xbf16>
    %41 = vector.shape_cast %38 : vector<4x256xbf16> to vector<1x4x256xbf16>
    tpu.vector_store %arg11[%c0_24, %c0_25, %c0_26], %41 {strides = array<i32>} : memref<1x4x256xbf16, #tpu.memory_space<vmem>>, vector<1x4x256xbf16>,
    %c2 = arith.constant 2 : index
    %42 = memref.load %arg9[%c2] : memref<3xf32, #tpu.memory_space<smem>>
    %cst_27 = arith.constant 0.000000e+00 : f32
    %43 = vector.broadcast %cst_27 : f32 to vector<8x256xf32>
    %44 = arith.maximumf %17, %43 : vector<8x256xf32>
    %cst_28 = arith.constant 0.000000e+00 : f32
    %45 = vector.broadcast %cst_28 : f32 to vector<8x256xf32>
    %46 = arith.minimumf %17, %45 : vector<8x256xf32>
    %47 = vector.broadcast %42 : f32 to vector<8x256xf32>
    %48 = arith.mulf %47, %46 : vector<8x256xf32>
    %49 = arith.addf %44, %48 : vector<8x256xf32>
    %cst_29 = arith.constant 1.000000e+00 : f32
    %50 = vector.broadcast %cst_29 : f32 to vector<1x256xf32>
    %51 = tpu.concatenate %49, %50 in 0 : vector<8x256xf32>, vector<1x256xf32> -> vector<9x256xf32>
    %52 = arith.truncf %51 : vector<9x256xf32> to vector<9x256xbf16>
    %c0_30 = arith.constant 0 : index
    %c0_31 = arith.constant 0 : index
    %c0_32 = arith.constant 0 : index
    %53 = vector.load %arg12[%c0_30, %c0_31, %c0_32] : memref<1x9x256xbf16, #tpu.memory_space<vmem>>, vector<1x9x256xbf16>
    %54 = vector.shape_cast %53 : vector<1x9x256xbf16> to vector<9x256xbf16>
    %55 = vector.shape_cast %52 : vector<9x256xbf16> to vector<1x9x256xbf16>
    tpu.vector_store %arg12[%c0_30, %c0_31, %c0_32], %55 {strides = array<i32>} : memref<1x9x256xbf16, #tpu.memory_space<vmem>>, vector<1x9x256xbf16>,
    return
  }
  func.func @transform_0(%arg0: i32, %arg1: i32) -> (i32, i32, i32) {
    %c0_i32 = arith.constant 0 : i32
    %c0_i32_0 = arith.constant 0 : i32
    return %arg0, %c0_i32, %arg1 : i32, i32, i32
  }
  func.func @transform_1(%arg0: i32, %arg1: i32) -> (i32, i32) {
    %c0_i32 = arith.constant 0 : i32
    %c0_i32_0 = arith.constant 0 : i32
    %c0_i32_1 = arith.constant 0 : i32
    return %c0_i32, %c0_i32_0 : i32, i32
  }
  func.func @transform_2(%arg0: i32, %arg1: i32) -> (i32, i32) {
    %c0_i32 = arith.constant 0 : i32
    %c0_i32_0 = arith.constant 0 : i32
    %c0_i32_1 = arith.constant 0 : i32
    return %c0_i32, %c0_i32_0 : i32, i32
  }
  func.func @transform_3(%arg0: i32, %arg1: i32) -> (i32, i32) {
    %c0_i32 = arith.constant 0 : i32
    %c0_i32_0 = arith.constant 0 : i32
    %c0_i32_1 = arith.constant 0 : i32
    return %c0_i32, %c0_i32_0 : i32, i32
  }
  func.func @transform_4(%arg0: i32, %arg1: i32) -> (i32, i32) {
    %c0_i32 = arith.constant 0 : i32
    %c0_i32_0 = arith.constant 0 : i32
    %c0_i32_1 = arith.constant 0 : i32
    return %c0_i32, %c0_i32_0 : i32, i32
  }
  func.func @transform_5(%arg0: i32, %arg1: i32) -> (i32, i32) {
    %c0_i32 = arith.constant 0 : i32
    %c0_i32_0 = arith.constant 0 : i32
    %c0_i32_1 = arith.constant 0 : i32
    return %c0_i32, %c0_i32_0 : i32, i32
  }
  func.func @transform_6(%arg0: i32, %arg1: i32) -> (i32, i32) {
    %c0_i32 = arith.constant 0 : i32
    %c0_i32_0 = arith.constant 0 : i32
    %c0_i32_1 = arith.constant 0 : i32
    return %c0_i32, %c0_i32_0 : i32, i32
  }
  func.func @transform_7(%arg0: i32, %arg1: i32) -> i32 {
    %c0_i32 = arith.constant 0 : i32
    %c0_i32_0 = arith.constant 0 : i32
    return %c0_i32 : i32
  }
  func.func @transform_8(%arg0: i32, %arg1: i32) -> (i32, i32, i32) {
    %c0_i32 = arith.constant 0 : i32
    %c0_i32_0 = arith.constant 0 : i32
    return %arg0, %c0_i32, %arg1 : i32, i32, i32
  }
  func.func @transform_9(%arg0: i32, %arg1: i32) -> (i32, i32, i32) {
    %c0_i32 = arith.constant 0 : i32
    %c0_i32_0 = arith.constant 0 : i32
    return %arg0, %c0_i32, %arg1 : i32, i32, i32
  }
  func.func @transform_10(%arg0: i32, %arg1: i32) -> (i32, i32, i32) {
    %c0_i32 = arith.constant 0 : i32
    %c0_i32_0 = arith.constant 0 : i32
    return %arg0, %c0_i32, %arg1 : i32, i32, i32
  }
}

</mosaic_0001>

<bundles_post_ra>
// kernel: tpu_custom_call.1
= control target key start
LH: loop header
LB: loop body
LE: loop exit
PB: predicated region body
PF: predicated region fallthrough
CT: control target
= control target key end

     0   :  { %s1534_s0 = inlined_call_operand.hbm [shape: f32[2,8,256], index: 0, kind: input, shape index: {}]   ;;  %s1535_s1 = inlined_call_operand.vmem [shape: bf16[4,8], index: 1, kind: input, shape index: {}]   ;;  %s1536_s2 = inlined_call_operand.vmem [shape: f32[4,1], index: 2, kind: input, shape index: {}]   ;;  %s1537_s3 = inlined_call_operand.vmem [shape: bf16[4,8], index: 3, kind: input, shape index: {}]   ;;  %s1538_s4 = inlined_call_operand.vmem [shape: f32[4,1], index: 4, kind: input, shape index: {}]   ;;  %s1539_s5 = inlined_call_operand.vmem [shape: bf16[8,8], index: 5, kind: input, shape index: {}]   ;;  %s1540_s6 = inlined_call_operand.vmem [shape: f32[8,1], index: 6, kind: input, shape index: {}]   ;;  %s1541_s7 = inlined_call_operand.vmem [shape: f32[3], index: 7, kind: input, shape index: {}]   ;;  %s1542_s8 = inlined_call_operand.hbm [shape: bf16[2,4,256], index: 8, kind: output, shape index: {0}]   ;;  %s1543_s9 = inlined_call_operand.hbm [shape: bf16[2,4,256], index: 9, kind: output, shape index: {1}]   ;;  %s1544_s10 = inlined_call_operand.vmem [shape: bf16[2,9,256], index: 10, kind: output, shape index: {2}]  }
   0x1   :  { %1552 = sst [smem:[#allocation17_spill]] %s1541_s7 }
   0x2   :  { %16 = vsyncpa [#allocation3], 0 }
   0x3   :  { %18 = vsyncpa [#allocation3 + $0x1], 0 }
   0x4   :  { %19 = vsyncpa [#allocation5], 0 }
   0x5   :  { %20 = vsyncpa [#allocation4], 0 }
   0x6   :  { %22 = vsyncpa [#allocation4 + $0x1], 0 }
   0x7   :  { %23 = vsyncpa [#allocation9], 0 }
   0x8   :  { %25 = vsyncpa [#allocation9 + $0x1], 0  ;;  %s1262_s13 = smov 0   ;;  %s1264_s14 = smov 0  }
   0x9   :  { %s1266_s15 = smov 0   ;;  %s1268_s16 = smov 0  }
   0xa   :  { %s1270_s17 = smov 0   ;;  %s1272_s18 = smov 0  }
   0xb LB: > { %1553 = sst [smem:[#allocation14_spill]] %s1196_s17  ;;  %s913_s19 = sadd.s32 4294967295, %s1200_s18   ;;  %s1200_s18 = sphi %s1272_s18, %s31_s18   ;;  %s1196_s17 = sphi %s1270_s17, %s1572_s17   ;;  %s1192_s16 = sphi %s1268_s16, %s1571_s16   ;;  %s1188_s15 = sphi %s1266_s15, %s1575_s15   ;;  %s1184_s14 = sphi %s1264_s14, %s1574_s14   ;;  %s1180_s13 = sphi %s1262_s13, %s1573_s13  }
   0xc   : > { %s914_s20 = sadd.s32 4294967294, %s1200_s18   ;;  %p65_p0 = scmp.ne.s32.totalorder %s1184_s14, %s1180_s13 }
   0xd   : > { %p1296_p1 = scmp.eq.s32.totalorder %s913_s19, 0  ;;  %p1300_p2 = scmp.eq.s32.totalorder %s913_s19, 1 }
   0xe   : > { %p244_p3 = scmp.eq.s32.totalorder %s914_s20, 1  ;;  %p915_p5 = scmp.ge.s32.totalorder %s1200_s18, 1 }
   0xf   : > { %s1554_s21 = scalar_select %p1296_p1, 1, 0 }
  0x10   : > { %p1306_p4 = por %p1296_p1, %p65_p0  ;;  %p1311_p6 = por %p244_p3, %p65_p0 }
  0x11   : > { %p307_p7 = scmp.lt.s32.totalorder %s1200_s18, 3  ;;  %s1559_s7 = sld [smem:[#allocation17_spill]] }
  0x12   : > { %s1556_s23 = scalar_select %p1306_p4, 1, 0 }
  0x13   : > { %s1557_s24 = scalar_select %p1311_p6, 1, 0 }
  0x14   : > { %p1319_p8 = pnand %p915_p5, %p307_p7  ;;  %s43_s30 = sadd.s32 1, %s1196_s17 }
  0x15   : > { %1558 = sst [smem:[#allocation15_spill]] %s1557_s24  ;;  %s52_s11 = sadd.s32 1, %s1188_s15 }
  0x16   : > { %p966_p10 = pneg %p1319_p8  ;;  %p45_p12 = scmp.ge.s32.totalorder %s43_s30, 2 }
  0x17   : > { %s338_s27 = sshll.u32 %s1559_s7, 4  ;;  %s339_s27 = int_to_ptr.vmem [resolvable:$true] %s338_s27 }
  0x18   : > { %p1328_p11 = pnand %p966_p10, %p1296_p1  ;;  %s1037_s12 = scalar_lea.vmem %s339_s27, 16 }
  0x19   : > { %p1038_p13 = scmp.ne.s32.totalorder %s339_s27, %s1037_s12  ;;  %p1045_p7 = scmp.lt.s32.totalorder %s339_s27, %s339_s27 }
  0x1a   : > { %p1039_p0 = pneg %p1328_p11  ;;  %p1046_p6 = scmp.lt.s32.totalorder %s1037_s12, %s1037_s12 }
  0x1c   : > { %p1040_p3 = pnand %p1039_p0, %p1038_p13  ;;  %p1047_p9 = por %p1046_p6, %p1045_p7 }
  0x1e   : > { %p1041_p5 = pneg %p1040_p3 }
  0x20   : > { %p1048_p4 = pnand %p1047_p9, %p1041_p5 }
  0x22   : > { %1051 = shalt.err (!%p1048_p4)
}
  0x23   : > { %s1202_s19 = smov [#allocation6]   ;;  %s1577_s30 = smov (%p45_p12, %s43_s30), 0 }
  0x24   : > { %969 = dma.vmem_to_smem (!%p1328_p11), %s339_s27, 16, %s1202_s19, [#allocation5]  }
  0x25   : > { %1562 = sst [smem:[#allocation16_spill]] %s1577_s30  ;;  %p59_p10 = scmp.ne.s32.totalorder %s1188_s15, %s1184_s14 }
  0x26   : > { %p60_p6 = scmp.eq.s32.totalorder %s1200_s18, 0  ;;  %s47_s20 = ssub.s32 %s1196_s17, %s1577_s30 }
  0x27   : > { %p982_p4 = scmp.lt.s32.totalorder %s1200_s18, 2  ;;  %p50_p9 = scmp.eq.s32.totalorder %s47_s20, 0 }
  0x28   : > { %p61_p13 = por %p60_p6, %p59_p10  ;;  %p1348_p0 = por %p1300_p2, %p59_p10 }
  0x29   : > { %s349_s26 = sand.u32 1, %s1188_s15   ;;  %s950_s7 = sshll.u32 %s1196_s17, 8 }
  0x2a   : > { %s1563_s25 = scalar_select %p1348_p0, 1, 0 }
  0x2b   : > { %s1354_s29 = scalar_select %p50_p9, %s1188_s15, %s52_s11  }
  0x2c   : > { %s918_s12 = sshll.u32 %s349_s26, 4  ;;  %s1360_s24 = scalar_lea.hbm %s1534_s0, %s950_s7 }
  0x2d   : > { %s353_s20 = scalar_lea.vmem [#allocation2], %s918_s12  ;;  %p1364_p2 = pnand %p982_p4, %p61_p13 }
  0x2e   : > { %s363_s22 = sshll.u32 %s353_s20, 4  ;;  %s350_s11 = scalar_lea.sflag [#allocation3], %s349_s26  ;;  %s1362_s22 = int_to_ptr.vmem [resolvable:$true] %s363_s22 }
  0x2f   : > { %s1052_s17 = scalar_lea.hbm %s1360_s24, 256  ;;  %p1054_p12 = pneg %p1364_p2 }
  0x30   : > { %p1053_p11 = scmp.ne.s32.totalorder %s1360_s24, %s1052_s17  ;;  %s1057_s27 = scalar_lea.hbm %s1534_s0, 512 }
  0x31   : > { %p1058_p7 = scmp.lt.u32.totalorder %s1360_s24, %s1534_s0  ;;  %p1059_p10 = scmp.lt.u32.totalorder %s1057_s27, %s1052_s17 }
  0x32   : > { %p1055_p3 = pnand %p1054_p12, %p1053_p11  ;;  %p1061_p4 = scmp.lt.u32.totalorder %s1052_s17, %s1360_s24 }
  0x33   : > { %p1060_p6 = por %p1059_p10, %p1058_p7 }
  0x34   : > { %p1056_p5 = pneg %p1055_p3 }
  0x35   : > { %p1062_p9 = por %p1061_p4, %p1060_p6 }
  0x37   : > { %p1063_p13 = pnand %p1062_p9, %p1056_p5 }
  0x39   : > { %1066 = shalt.err (!%p1063_p13)
}
  0x3a   : > { %s1067_s26 = scalar_lea.vmem %s1362_s22, 256  ;;  %s1203_s7 = smov [#allocation2]  }
  0x3b   : > { %p1068_p11 = scmp.ne.s32.totalorder %s1362_s22, %s1067_s26  ;;  %s1072_s12 = sshll.u32 %s1203_s7, 4  ;;  %s1073_s12 = int_to_ptr.vmem [resolvable:$false] %s1072_s12 }
  0x3c   : > { %s1074_s19 = scalar_lea.vmem %s1073_s12, 512  ;;  %p1075_p1 = scmp.lt.s32.totalorder %s1362_s22, %s1073_s12 }
  0x3d   : > { %p1070_p3 = pnand %p1068_p11, %p1054_p12  ;;  %p1076_p7 = scmp.lt.s32.totalorder %s1074_s19, %s1067_s26 }
  0x3f   : > { %p1071_p0 = pneg %p1070_p3  ;;  %p1077_p10 = por %p1076_p7, %p1075_p1 }
  0x41   : > { %p1078_p6 = pnand %p1077_p10, %p1071_p0 }
  0x43   : > { %1081 = shalt.err (!%p1078_p6)
}
  0x44   : > { %973 = dma.hbm_to_vmem [thread:$0]  (!%p1364_p2), %s1360_s24, 256, %s1362_s22, %s350_s11  }
  0x45   : > { %372 = sbr.rel (%p1319_p8) target bundleno = 354 (0x162), region = 52  ;;  %s1396_s17 = sand.u32 (!%p1319_p8), 1, %s1184_s14  }
  0x46   : > { %s922_s27 = sshll.u32 (!%p1319_p8), %s1396_s17, 4  ;;  %s375_s20 = scalar_lea.sflag (!%p1319_p8), [#allocation3], %s1396_s17 }
  0x47   : > { %s378_s26 = scalar_lea.vmem (!%p1319_p8), [#allocation2], %s922_s27  ;;  %p1565_p1 = scmp.ne.s32.totalorder (!%p1319_p8), %s1556_s23, 0 }
  0x4c   : > { %1163 = dma.done.wait (%p1565_p1), %s375_s20, 256  }
  0x4d   : > { %1165 = vsyncadd (%p1565_p1), %s375_s20, 4294967040  ;;  %p1566_p0 = scmp.ne.s32.totalorder %s1554_s21, 0 }
  0x4f   : > { %1167 = dma.done.wait (%p1566_p0), [#allocation5], 16  }
  0x50   : > { %1169 = vsyncadd (%p1566_p0), [#allocation5], 4294967280 }
  0x51   : > { %387 = sfence }
  0x52   : > { %v449_v0 = vld [vmem:[%s378_s26 + $0x8] sm:$0xff]  ;;  %vm463_vm0 = vcmask 1043456   ;;  %v448_v1 = vld [vmem:[%s378_s26] sm:$0xff]  ;;  %v1204_v4 = vmov 0   ;;  %vm459_vm1 = vcmask 64512   ;;  %p438_p8 = scmp.lt.s32.totalorder %s1192_s16, 1 }
  0x53   : > { %v451_v2 = vpack.c.bf16 %v449_v0, %v449_v0  ;;  %v450_v3 = vpack.c.bf16 %v448_v1, %v448_v1  ;;  %502 = vmatprep.mubr.bf16.mxu0 %v1204_v4  ;;  %553 = vmatprep.mubr.bf16.mxu1 %v1204_v4  ;;  %v453_v5 = vld [vmem:[%s1536_s2] sm:$0xf]  ;;  %vm684_vm2 = vcmask 1040384   ;;  %vm685_vm3 = vsmask.f32 256  ;;  %s613_s30 = sld [smem:[#allocation6]] }
  0x54   : > { %1035 = vset.pattern.permute.xlu0 %v1204_v4  ;;  %1036 = vset.pattern.permute.xlu1 %v1204_v4  ;;  %v563_v7 = vld [vmem:[%s1540_s6] sm:$0xff]  ;;  %s439_s26 = scalar_select %p438_p8, %s1192_s16, 1  ;;  %vm687_vm4 = vcmask 1044484   ;;  %vm686_vm5 = vmand %vm684_vm2, %vm685_vm3  ;;  %vm688_vm6 = vsmask.f32 4352 }
  0x55   : > { %928 = vmatprep.subr.msk.bf16.mxu0 %vm463_vm0, %v451_v2  ;;  %v465_v6 = vsel %vm463_vm0, %v450_v3, 0  ;;  %930 = vmatprep.subr.msk.bf16.mxu1 %vm463_vm0, %v451_v2  ;;  %v452_v8 = vld [vmem:[%s1535_s1] sm:$0x3]  ;;  %vm689_vm7 = vmand %vm687_vm4, %vm688_vm6  ;;  %s936_s22 = sld [smem:[#allocation6 + $0x1]]  ;;  %s1439_s11 = sld [smem:[#allocation6 + $0x2]] }
  0x56   : > { %471 = vmatpush1.bf16.msra.mxu0 %v465_v6  ;;  %522 = vmatpush1.bf16.msra.mxu1 %v465_v6  ;;  %v511_v9 = vld [vmem:[%s1537_s3] sm:$0x3]  ;;  %s951_s24 = sshll.u32 %s439_s26, 4  ;;  %vm690_vm8 = vmor %vm689_vm7, %vm686_vm5  ;;  %s924_s7 = sshll.u32 %s1396_s17, 2 }
  0x57   : > { %932 = vmatprep.subr.msk.bf16.mxu0 %vm463_vm0, %v451_v2  ;;  %456 = vperm.xlu0 %1035, %v453_v5   ;;  %v512_v10 = vld [vmem:[%s1538_s4] sm:$0xf]  ;;  %s1435_s23 = scalar_lea.vmem %s1544_s10, %s951_s24  ;;  %s954_s12 = sshll.u32 %s1192_s16, 6 }
  0x58   : > { %566 = vperm.xlu1 %1036, %v563_v7   ;;  %v562_v11 = vld [vmem:[%s1539_s5] sm:$0xf]  ;;  %v691_v12 = vld [vmem:[%s1435_s23 + $0x8] sm:$0x11]  ;;  %s415_s19 = scalar_lea.vmem [#allocation7], %s924_s7  ;;  %s422_s20 = scalar_lea.vmem [#allocation8], %s924_s7 }
  0x59   : > { %929 = vmatmul.mubr.msk.bf16.vlgmr.msra.gmra.mrb[0].mxu0 %vm459_vm1, %v452_v8  ;;  %931 = vmatmul.mubr.msk.bf16.vlgmr.msra.gmra.mrb[0].mxu1 %vm459_vm1, %v511_v9  ;;  %v692_v13 = vsel %vm690_vm8, 1.0|1.0, %v691_v12  ;;  %v618_v22 = vstv %s613_s30  ;;  %s725_s27 = sshll.u32 %s415_s19, 4  ;;  %s741_s26 = sshll.u32 %s422_s20, 4  ;;  %s1453_s27 = int_to_ptr.vmem [resolvable:$true] %s725_s27  ;;  %s1461_s26 = int_to_ptr.vmem [resolvable:$true] %s741_s26 }
  0x5a   : > { %573 = vmatpush1.bf16.msra.mxu0 %v465_v6  ;;  %604 = vmatprep.mubr.bf16.mxu0 %v1204_v4  ;;  %693 = vst [vmem:[%s1435_s23 + $0x8] sm:$0x11] %v692_v13  ;;  %s1448_s21 = scalar_lea.hbm %s1542_s8, %s954_s12  ;;  %s1082_s7 = scalar_lea.vmem %s1453_s27, 64 }
  0x5b   : > { %515 = vperm.xlu0 %1035, %v512_v10   ;;  %v642_v25 = vstv %s936_s22  ;;  %v666_v50 = vstv %s1439_s11  ;;  %s1459_s22 = scalar_lea.hbm %s1543_s9, %s954_s12  ;;  %s695_s11 = scalar_lea.sflag [#allocation4], %s1396_s17 }
  0x5c   : > { %p1083_p2 = scmp.ne.s32.totalorder %s1453_s27, %s1082_s7  ;;  %p1567_p12 = scmp.ne.s32.totalorder %s1563_s25, 0 }
  0x5d   : > { %s1205_s24 = smov [#allocation7]  }
  0x5e   : > { %p1084_p5 = pnand %p1083_p2, %p1567_p12  ;;  %s1086_s28 = sshll.u32 %s1205_s24, 4  ;;  %s1087_s28 = int_to_ptr.vmem [resolvable:$false] %s1086_s28 }
  0x5f   : > { %s1088_s12 = scalar_lea.vmem %s1087_s28, 128  ;;  %p1089_p9 = scmp.lt.s32.totalorder %s1453_s27, %s1087_s28 }
  0x60   : > { %p1085_p4 = pneg %p1084_p5  ;;  %p1090_p13 = scmp.lt.s32.totalorder %s1088_s12, %s1082_s7 }
  0x61   : > { %933 = vmatmul.mubr.msk.bf16.vlgmr.msra.gmra.mrb[4].mxu0 %vm459_vm1, %v562_v11 }
  0x62   : > { %p1091_p11 = por %p1090_p13, %p1089_p9 }
  0x64   : > { %p1092_p3 = pnand %p1091_p11, %p1085_p4 }
  0xd6   : > { %v457_v14 = vpop.permute.xlu0 %456 }
  0xd7   : > { %v567_v42 = vpop.permute.xlu1 %566 }
  0xda   : > { %v516_v15 = vpop.permute.xlu0 %515 }
 0x12c   : > { %v504_v16 = vpop.f32.mrb[0].mxu0  ;;  %v555_v17 = vpop.f32.mrb[0].mxu1 }
 0x12d   : > { %v505_v18 = vadd.f32 %v504_v16, %v457_v14  ;;  %v506_v19 = vpop.f32.mrb[1].mxu0  ;;  %v556_v20 = vadd.f32 %v555_v17, %v516_v15  ;;  %v557_v21 = vpop.f32.mrb[1].mxu1 }
 0x12e   : > { %v507_v23 = vadd.f32 %v506_v19, %v457_v14  ;;  %v508_v24 = vpop.f32.mrb[2].mxu0  ;;  %v558_v26 = vadd.f32 %v557_v21, %v516_v15  ;;  %v559_v27 = vpop.f32.mrb[2].mxu1 }
 0x12f   : > { %v616_v28 = vmin.f32 %v505_v18, 0.0  ;;  %v638_v29 = vmax.f32 %v556_v20, 0.0  ;;  %v640_v30 = vmin.f32 %v556_v20, 0.0  ;;  %v509_v31 = vpop.f32.mrb[3].mxu0  ;;  %v560_v32 = vpop.f32.mrb[3].mxu1  ;;  %v614_v36 = vmax.f32 %v505_v18, 0.0 }
 0x130   : > { %v617_v33 = vmin.f32 %v507_v23, 0.0  ;;  %v639_v34 = vmax.f32 %v558_v26, 0.0  ;;  %v641_v35 = vmin.f32 %v558_v26, 0.0  ;;  %v615_v39 = vmax.f32 %v507_v23, 0.0 }
 0x131   : > { %v619_v37 = vmul.f32 %v618_v22, %v616_v28  ;;  %v643_v38 = vmul.f32 %v642_v25, %v640_v30 }
 0x132   : > { %v620_v40 = vmul.f32 %v618_v22, %v617_v33  ;;  %v644_v41 = vmul.f32 %v642_v25, %v641_v35 }
 0x133   : > { %v621_v43 = vadd.f32 %v619_v37, %v614_v36  ;;  %v645_v44 = vadd.f32 %v643_v38, %v638_v29 }
 0x134   : > { %v622_v45 = vadd.f32 %v620_v40, %v615_v39  ;;  %v646_v46 = vadd.f32 %v644_v41, %v639_v34  ;;  %v606_v47 = vpop.f32.mrb[4].mxu0 }
 0x135   : > { %v1443_v48 = vadd.f32 %v606_v47, %v567_v42  ;;  %v608_v49 = vpop.f32.mrb[5].mxu0 }
 0x136   : > { %v1451_v51 = vadd.f32 %v608_v49, %v567_v42  ;;  %v610_v52 = vpop.f32.mrb[6].mxu0  ;;  %v934_v53 = vpack.c.bf16 %v622_v45, %v621_v43  ;;  %v937_v54 = vpack.c.bf16 %v646_v46, %v645_v44 }
 0x137   : > { %v664_v55 = vmin.f32 %v1443_v48, 0.0  ;;  %v611_v56 = vpop.f32.mrb[7].mxu0  ;;  %v662_v58 = vmax.f32 %v1443_v48, 0.0 }
 0x138   : > { %v665_v57 = vmin.f32 %v1451_v51, 0.0  ;;  %935 = vst.sshfl [vmem:[%s415_s19] sm:$0x33 pattern:$0x76325410] %v934_v53 }
 0x139   : > { %938 = vst.sshfl [vmem:[%s422_s20] sm:$0x33 pattern:$0x76325410] %v937_v54  ;;  %v667_v59 = vmul.f32 %v666_v50, %v664_v55 }
 0x13a   : > { %1095 = shalt.err (!%p1092_p3)
}
 0x13b   : > { %s1096_s19 = scalar_lea.hbm %s1448_s21, 64  ;;  %s1100_s30 = scalar_lea.hbm %s1542_s8, 128 }
 0x13c   : > { %p1097_p7 = scmp.ne.s32.totalorder %s1448_s21, %s1096_s19  ;;  %p1101_p1 = scmp.lt.u32.totalorder %s1448_s21, %s1542_s8 }
 0x13d   : > { %p1102_p0 = scmp.lt.u32.totalorder %s1100_s30, %s1096_s19  ;;  %p1104_p2 = scmp.lt.u32.totalorder %s1096_s19, %s1448_s21 }
 0x13e   : > { %p1098_p10 = pnand %p1097_p7, %p1567_p12 }
 0x13f   : > { %p1103_p8 = por %p1102_p0, %p1101_p1 }
 0x140   : > { %p1099_p6 = pneg %p1098_p10 }
 0x141   : > { %p1105_p5 = por %p1104_p2, %p1103_p8 }
 0x143   : > { %p1106_p4 = pnand %p1105_p5, %p1099_p6 }
 0x145   : > { %1109 = shalt.err (!%p1106_p4)
}
 0x146   : > { %962 = dma.vmem_to_hbm [thread:$0]  (%p1567_p12), %s1453_s27, 64, %s1448_s21, %s695_s11   ;;  %v663_v60 = vmax.f32 %v1451_v51, 0.0  ;;  %v668_v61 = vmul.f32 %v666_v50, %v665_v57 }
 0x147   : > { %s700_s7 = scalar_lea.sflag [#allocation9], %s1396_s17  ;;  %s1110_s12 = scalar_lea.vmem %s1461_s26, 64 }
 0x148   : > { %p1111_p9 = scmp.ne.s32.totalorder %s1461_s26, %s1110_s12  ;;  %s1206_s19 = smov [#allocation8]  }
 0x149   : > { %s1114_s20 = sshll.u32 %s1206_s19, 4  ;;  %s1115_s20 = int_to_ptr.vmem [resolvable:$false] %s1114_s20 }
 0x14a   : > { %p1112_p13 = pnand %p1111_p9, %p1567_p12  ;;  %s1116_s16 = scalar_lea.vmem %s1115_s20, 128 }
 0x14b   : > { %p1117_p3 = scmp.lt.s32.totalorder %s1461_s26, %s1115_s20  ;;  %p1118_p7 = scmp.lt.s32.totalorder %s1116_s16, %s1110_s12 }
 0x14c   : > { %p1113_p11 = pneg %p1112_p13 }
 0x14d   : > { %p1119_p10 = por %p1118_p7, %p1117_p3 }
 0x14f   : > { %p1120_p6 = pnand %p1119_p10, %p1113_p11 }
 0x151   : > { %1123 = shalt.err (!%p1120_p6)
}
 0x152   : > { %s1124_s17 = scalar_lea.hbm %s1459_s22, 64  ;;  %s1128_s11 = scalar_lea.hbm %s1543_s9, 128 }
 0x153   : > { %p1125_p1 = scmp.ne.s32.totalorder %s1459_s22, %s1124_s17  ;;  %p1129_p2 = scmp.lt.u32.totalorder %s1459_s22, %s1543_s9 }
 0x154   : > { %p1130_p5 = scmp.lt.u32.totalorder %s1128_s11, %s1124_s17  ;;  %p1132_p9 = scmp.lt.u32.totalorder %s1124_s17, %s1459_s22 }
 0x155   : > { %p1126_p0 = pnand %p1125_p1, %p1567_p12 }
 0x156   : > { %p1131_p4 = por %p1130_p5, %p1129_p2 }
 0x157   : > { %p1127_p8 = pneg %p1126_p0 }
 0x158   : > { %p1133_p13 = por %p1132_p9, %p1131_p4 }
 0x15a   : > { %p1134_p11 = pnand %p1133_p13, %p1127_p8 }
 0x15c   : > { %1137 = shalt.err (!%p1134_p11)
}
 0x15d   : > { %963 = dma.vmem_to_hbm [thread:$0]  (%p1567_p12), %s1461_s26, 64, %s1459_s22, %s700_s7   ;;  %v669_v62 = vadd.f32 %v667_v59, %v662_v58  ;;  %v670_v63 = vadd.f32 %v668_v61, %v663_v60 }
 0x15f   : > { %v952_v0 = vpack.c.bf16 %v670_v63, %v669_v62 }
 0x161   : > { %683 = vst [vmem:[%s1435_s23] sm:$0xff] %v952_v0 }
 0x162 PF: > { %s1568_s28 = sld [smem:[#allocation15_spill]]  ;;  %s757_s12 = sand.u32 1, %s1180_s13  }
 0x163   : > { %p1570_p7 = scmp.ge.s32.totalorder %s1200_s18, 2  ;;  %s758_s19 = scalar_lea.sflag [#allocation4], %s757_s12 }
 0x168   : > { %p1569_p3 = scmp.ne.s32.totalorder %s1568_s28, 0 }
 0x16a   : > { %p975_p10 = pnand %p1570_p7, %p1569_p3 }
 0x16c   : > { %1171 = dma.done.wait (!%p975_p10), %s758_s19, 64  }
 0x16d   : > { %1173 = vsyncadd (!%p975_p10), %s758_s19, 4294967232  ;;  %s767_s25 = scalar_lea.sflag [#allocation9], %s757_s12 }
 0x16e   : > { %1175 = dma.done.wait (!%p975_p10), %s767_s25, 64  }
 0x16f   : > { %1177 = vsyncadd (!%p975_p10), %s767_s25, 4294967232  ;;  %s31_s18 = sadd.s32 1, %s1200_s18   ;;  %s1571_s16 = sld [smem:[#allocation14_spill]] }
 0x170   : > { %p28_p12 = scmp.ge.s32.totalorder %s31_s18, 4   ;;  %s1572_s17 = sld [smem:[#allocation16_spill]] }
 0x171   : > { %s1573_s13 = smov %s1184_s14  ;;  %s1574_s14 = smov %s1188_s15 }
 0x172   : > { %s1575_s15 = smov %s1354_s29  ;;  %30 = sbr.rel (!%p28_p12) target bundleno = 11 (0xb), region = 131 }
 0x179   :  { %784 = vsyncpa [#allocation3], 1 }
 0x17a   :  { %786 = vsyncpa [#allocation3 + $0x1], 1 }
 0x17b   :  { %787 = vsyncpa [#allocation4], 1 }
 0x17c   :  { %789 = vsyncpa [#allocation4 + $0x1], 1 }
 0x17d   :  { %790 = vsyncpa [#allocation9], 1 }
 0x17e   :  { %792 = vsyncpa [#allocation9 + $0x1], 1 }
 0x17f   :  { %793 = vsyncpa [#allocation5], 1 }
 0x180   :  { %795 = vsyncpa [#allocation5 + $0x1], 1 }

</bundles_post_ra>
